<compile_context>
chip_gen: v7x
topology: tpu7x:2x2x1
jax: 0.10.0
libtpu: 0.0.40
codegen_flags: <defaults>
</compile_context>

<pallas_src>
import functools

import jax
import jax.numpy as jnp
from jax.experimental import pallas as pl
from jax.experimental.pallas import tpu as pltpu


def _pooling_cnn_kernel(x_ref, wb_ref, o_ref, *,
                        n, c_in, c_out, kernel_size, padding,
                        length, l_out, pool_size, l_pool):
    """Whole-batch fused Conv1d -> MaxPool1d -> ReLU (PyTorch NCL layout).

    x_ref  : (N, C_in, L)                 input
    wb_ref : (C_out, C_in*K + 1)          [conv weight | bias] slab
    o_ref  : (N, C_out, L_pool)           output
    """
    f32 = jnp.float32

    x = x_ref[...].astype(f32)                               # (N, C_in, L)
    wb = wb_ref[...].astype(f32)                             # (C_out, C_in*K + 1)
    w_val = wb[:, :c_in * kernel_size]                       # (C_out, C_in*K)
    b_val = wb[:, c_in * kernel_size:c_in * kernel_size + 1]  # (C_out, 1)

    # --- conv zero-padding built in registers (no VMEM scratch) -------------
    if padding > 0:
        zpad = jnp.zeros((n, c_in, padding), dtype=f32)
        x_pad = jnp.concatenate([zpad, x, zpad], axis=-1)    # (N, C_in, L + 2P)
    else:
        x_pad = x

    # --- Conv1d as K*C_in unrolled VPU broadcast-MACs (MXU left idle) -------
    # acc[b, o, l] = sum_{c,k} weight[o, c, k] * x_pad[b, c, l + k]
    acc = jnp.zeros((n, c_out, l_out), dtype=f32)
    for k in range(kernel_size):
        xk = x_pad[:, :, k:k + l_out]                        # one lane shift per k
        for c in range(c_in):
            xs = xk[:, c:c + 1, :]                           # (N, 1, L_out) sublane slice
            col = c * kernel_size + k
            wc = w_val[:, col:col + 1]                       # (C_out, 1)
            acc = acc + xs * wc[None, :, :]                  # (N, C_out, L_out)

    # --- MaxPool1d (kernel = stride = pool_size, floor mode), pure VPU/XLU --
    if pool_size == 1:
        pooled = acc[:, :, :l_pool]
    else:
        valid = (l_pool - 1) * pool_size + 1
        m = acc[:, :, 0:valid]
        for p in range(1, pool_size):
            m = jnp.maximum(m, acc[:, :, p:p + valid])       # running max over window
        cols = [m[:, :, j * pool_size:j * pool_size + 1] for j in range(l_pool)]
        pooled = jnp.concatenate(cols, axis=-1) if l_pool > 1 else cols[0]

    # --- bias (commutes with max) + ReLU, single whole-output store ---------
    out = jnp.maximum(pooled + b_val[None, :, :], 0.0)       # (N, C_out, L_pool)
    o_ref[...] = out.astype(o_ref.dtype)


def pooling_cnn(x_ncl, weight, bias, *, padding, pool_size):
    """x_ncl: (N, C_in, L); weight: (C_out, C_in, K); bias: (C_out,).

    Returns (N, C_out, L_pool), matching
    nn.Conv1d(padding=padding) -> nn.MaxPool1d(pool_size) -> nn.ReLU().
    """
    n, c_in, length = x_ncl.shape
    c_out, c_in_w, kernel_size = weight.shape
    assert c_in == c_in_w

    l_pad = length + 2 * padding
    l_out = l_pad - kernel_size + 1          # Conv1d, stride=1, dilation=1
    l_pool = l_out // pool_size              # MaxPool1d floor mode
    assert l_out >= 1 and l_pool >= 1

    # Fuse weight + bias into one slab -> one fewer tiny input DMA.
    wb = jnp.concatenate(
        [weight.reshape(c_out, c_in * kernel_size).astype(x_ncl.dtype),
         bias.reshape(c_out, 1).astype(x_ncl.dtype)],
        axis=1)                               # (C_out, C_in*K + 1)

    kernel = functools.partial(
        _pooling_cnn_kernel,
        n=n, c_in=c_in, c_out=c_out, kernel_size=kernel_size,
        padding=padding, length=length, l_out=l_out,
        pool_size=pool_size, l_pool=l_pool)

    return pl.pallas_call(
        kernel,
        out_shape=jax.ShapeDtypeStruct((n, c_out, l_pool), x_ncl.dtype),
        grid=(1,),
        in_specs=[
            pl.BlockSpec((n, c_in, length), lambda i: (0, 0, 0)),
            pl.BlockSpec((c_out, c_in * kernel_size + 1), lambda i: (0, 0)),
        ],
        out_specs=pl.BlockSpec((n, c_out, l_pool), lambda i: (0, 0, 0)),
        compiler_params=pltpu.CompilerParams(
            dimension_semantics=("arbitrary",)),   # single step; no TC split
    )(x_ncl, wb)


def _reference(x_ncl, weight, bias, *, padding, pool_size):
    """Pure-JAX reference mirroring nn.Conv1d -> nn.MaxPool1d -> ReLU."""
    conv = jax.lax.conv_general_dilated(
        x_ncl, weight, window_strides=(1,), padding=[(padding, padding)],
        dimension_numbers=("NCH", "OIH", "NCH"))
    conv = conv + bias[None, :, None]
    n, c, l_out = conv.shape
    l_pool = l_out // pool_size
    pooled = conv[:, :, :l_pool * pool_size].reshape(n, c, l_pool, pool_size)
    pooled = jnp.max(pooled, axis=-1)
    return jnp.maximum(pooled, 0.0)


if __name__ == "__main__":
    # Module hyperparameters (Conv1d: in=4, out=8, k=3, padding=1; pool=2).
    in_channels, out_channels, kernel_size, padding, pool_size = 4, 8, 3, 1, 2
    batch, seq = 2, 16

    key = jax.random.PRNGKey(0)
    kx, kw, kb = jax.random.split(key, 3)
    x = jax.random.normal(kx, (batch, in_channels, seq), dtype=jnp.float32)
    weight = jax.random.normal(
        kw, (out_channels, in_channels, kernel_size), dtype=jnp.float32) * 0.1
    bias = jax.random.normal(kb, (out_channels,), dtype=jnp.float32) * 0.1

    out = pooling_cnn(x, weight, bias, padding=padding, pool_size=pool_size)
    out = jax.block_until_ready(out)

    ref = _reference(x, weight, bias, padding=padding, pool_size=pool_size)
    assert out.shape == ref.shape, (out.shape, ref.shape)
    assert jnp.allclose(out, ref, atol=1e-5, rtol=1e-5), "mismatch vs reference"

    print("KERNEL_OK")
</pallas_src>

<mosaic_0001>
module attributes {stable_mosaic.version = 11 : i64} {
  func.func @_pooling_cnn_kernel(%arg0: i32, %arg1: memref<2x4x16xf32, #tpu.memory_space<vmem>>, %arg2: memref<8x13xf32, #tpu.memory_space<vmem>>, %arg3: memref<2x8x8xf32, #tpu.memory_space<vmem>>) attributes {dimension_semantics = [#tpu.dimension_semantics<arbitrary>], iteration_bounds = array<i64: 1>, scalar_prefetch = 0 : i64, scratch_operands = 0 : i64, tpu.core_type = #tpu.core_type<tc>, window_params = [{pipeline_mode = #tpu.pipeline_mode<synchronous>, transform_indices = @transform_0, window_bounds = array<i64: 2, 4, 16>}, {pipeline_mode = #tpu.pipeline_mode<synchronous>, transform_indices = @transform_1, window_bounds = array<i64: 8, 13>}, {pipeline_mode = #tpu.pipeline_mode<synchronous>, transform_indices = @transform_2, window_bounds = array<i64: 2, 8, 8>}]} {
    %c0 = arith.constant 0 : index
    %c0_0 = arith.constant 0 : index
    %c0_1 = arith.constant 0 : index
    %0 = vector.load %arg1[%c0, %c0_0, %c0_1] : memref<2x4x16xf32, #tpu.memory_space<vmem>>, vector<2x4x16xf32>
    %c0_2 = arith.constant 0 : index
    %c0_3 = arith.constant 0 : index
    %1 = vector.load %arg2[%c0_2, %c0_3] : memref<8x13xf32, #tpu.memory_space<vmem>>, vector<8x13xf32>
    %2 = vector.extract_strided_slice %1 {offsets = [0, 0], sizes = [8, 12], strides = [1, 1]} : vector<8x13xf32> to vector<8x12xf32>
    %3 = vector.extract_strided_slice %1 {offsets = [0, 12], sizes = [8, 1], strides = [1, 1]} : vector<8x13xf32> to vector<8x1xf32>
    %cst = arith.constant 0.000000e+00 : f32
    %4 = vector.broadcast %cst : f32 to vector<2x4x1xf32>
    %5 = tpu.concatenate %4, %0, %4 in 2 : vector<2x4x1xf32>, vector<2x4x16xf32>, vector<2x4x1xf32> -> vector<2x4x18xf32>
    %cst_4 = arith.constant 0.000000e+00 : f32
    %6 = vector.broadcast %cst_4 : f32 to vector<2x8x16xf32>
    %7 = vector.extract_strided_slice %5 {offsets = [0, 0, 0], sizes = [2, 4, 16], strides = [1, 1, 1]} : vector<2x4x18xf32> to vector<2x4x16xf32>
    %8 = vector.extract_strided_slice %7 {offsets = [0, 0, 0], sizes = [2, 1, 16], strides = [1, 1, 1]} : vector<2x4x16xf32> to vector<2x1x16xf32>
    %9 = vector.extract_strided_slice %2 {offsets = [0, 0], sizes = [8, 1], strides = [1, 1]} : vector<8x12xf32> to vector<8x1xf32>
    %10 = vector.shape_cast %9 : vector<8x1xf32> to vector<1x8x1xf32>
    %11 = vector.broadcast %8 : vector<2x1x16xf32> to vector<2x8x16xf32>
    %12 = vector.broadcast %10 : vector<1x8x1xf32> to vector<2x8x16xf32>
    %13 = arith.mulf %11, %12 : vector<2x8x16xf32>
    %14 = arith.addf %6, %13 : vector<2x8x16xf32>
    %15 = vector.extract_strided_slice %7 {offsets = [0, 1, 0], sizes = [2, 1, 16], strides = [1, 1, 1]} : vector<2x4x16xf32> to vector<2x1x16xf32>
    %16 = vector.extract_strided_slice %2 {offsets = [0, 3], sizes = [8, 1], strides = [1, 1]} : vector<8x12xf32> to vector<8x1xf32>
    %17 = vector.shape_cast %16 : vector<8x1xf32> to vector<1x8x1xf32>
    %18 = vector.broadcast %15 : vector<2x1x16xf32> to vector<2x8x16xf32>
    %19 = vector.broadcast %17 : vector<1x8x1xf32> to vector<2x8x16xf32>
    %20 = arith.mulf %18, %19 : vector<2x8x16xf32>
    %21 = arith.addf %14, %20 : vector<2x8x16xf32>
    %22 = vector.extract_strided_slice %7 {offsets = [0, 2, 0], sizes = [2, 1, 16], strides = [1, 1, 1]} : vector<2x4x16xf32> to vector<2x1x16xf32>
    %23 = vector.extract_strided_slice %2 {offsets = [0, 6], sizes = [8, 1], strides = [1, 1]} : vector<8x12xf32> to vector<8x1xf32>
    %24 = vector.shape_cast %23 : vector<8x1xf32> to vector<1x8x1xf32>
    %25 = vector.broadcast %22 : vector<2x1x16xf32> to vector<2x8x16xf32>
    %26 = vector.broadcast %24 : vector<1x8x1xf32> to vector<2x8x16xf32>
    %27 = arith.mulf %25, %26 : vector<2x8x16xf32>
    %28 = arith.addf %21, %27 : vector<2x8x16xf32>
    %29 = vector.extract_strided_slice %7 {offsets = [0, 3, 0], sizes = [2, 1, 16], strides = [1, 1, 1]} : vector<2x4x16xf32> to vector<2x1x16xf32>
    %30 = vector.extract_strided_slice %2 {offsets = [0, 9], sizes = [8, 1], strides = [1, 1]} : vector<8x12xf32> to vector<8x1xf32>
    %31 = vector.shape_cast %30 : vector<8x1xf32> to vector<1x8x1xf32>
    %32 = vector.broadcast %29 : vector<2x1x16xf32> to vector<2x8x16xf32>
    %33 = vector.broadcast %31 : vector<1x8x1xf32> to vector<2x8x16xf32>
    %34 = arith.mulf %32, %33 : vector<2x8x16xf32>
    %35 = arith.addf %28, %34 : vector<2x8x16xf32>
    %36 = vector.extract_strided_slice %5 {offsets = [0, 0, 1], sizes = [2, 4, 16], strides = [1, 1, 1]} : vector<2x4x18xf32> to vector<2x4x16xf32>
    %37 = vector.extract_strided_slice %36 {offsets = [0, 0, 0], sizes = [2, 1, 16], strides = [1, 1, 1]} : vector<2x4x16xf32> to vector<2x1x16xf32>
    %38 = vector.extract_strided_slice %2 {offsets = [0, 1], sizes = [8, 1], strides = [1, 1]} : vector<8x12xf32> to vector<8x1xf32>
    %39 = vector.shape_cast %38 : vector<8x1xf32> to vector<1x8x1xf32>
    %40 = vector.broadcast %37 : vector<2x1x16xf32> to vector<2x8x16xf32>
    %41 = vector.broadcast %39 : vector<1x8x1xf32> to vector<2x8x16xf32>
    %42 = arith.mulf %40, %41 : vector<2x8x16xf32>
    %43 = arith.addf %35, %42 : vector<2x8x16xf32>
    %44 = vector.extract_strided_slice %36 {offsets = [0, 1, 0], sizes = [2, 1, 16], strides = [1, 1, 1]} : vector<2x4x16xf32> to vector<2x1x16xf32>
    %45 = vector.extract_strided_slice %2 {offsets = [0, 4], sizes = [8, 1], strides = [1, 1]} : vector<8x12xf32> to vector<8x1xf32>
    %46 = vector.shape_cast %45 : vector<8x1xf32> to vector<1x8x1xf32>
    %47 = vector.broadcast %44 : vector<2x1x16xf32> to vector<2x8x16xf32>
    %48 = vector.broadcast %46 : vector<1x8x1xf32> to vector<2x8x16xf32>
    %49 = arith.mulf %47, %48 : vector<2x8x16xf32>
    %50 = arith.addf %43, %49 : vector<2x8x16xf32>
    %51 = vector.extract_strided_slice %36 {offsets = [0, 2, 0], sizes = [2, 1, 16], strides = [1, 1, 1]} : vector<2x4x16xf32> to vector<2x1x16xf32>
    %52 = vector.extract_strided_slice %2 {offsets = [0, 7], sizes = [8, 1], strides = [1, 1]} : vector<8x12xf32> to vector<8x1xf32>
    %53 = vector.shape_cast %52 : vector<8x1xf32> to vector<1x8x1xf32>
    %54 = vector.broadcast %51 : vector<2x1x16xf32> to vector<2x8x16xf32>
    %55 = vector.broadcast %53 : vector<1x8x1xf32> to vector<2x8x16xf32>
    %56 = arith.mulf %54, %55 : vector<2x8x16xf32>
    %57 = arith.addf %50, %56 : vector<2x8x16xf32>
    %58 = vector.extract_strided_slice %36 {offsets = [0, 3, 0], sizes = [2, 1, 16], strides = [1, 1, 1]} : vector<2x4x16xf32> to vector<2x1x16xf32>
    %59 = vector.extract_strided_slice %2 {offsets = [0, 10], sizes = [8, 1], strides = [1, 1]} : vector<8x12xf32> to vector<8x1xf32>
    %60 = vector.shape_cast %59 : vector<8x1xf32> to vector<1x8x1xf32>
    %61 = vector.broadcast %58 : vector<2x1x16xf32> to vector<2x8x16xf32>
    %62 = vector.broadcast %60 : vector<1x8x1xf32> to vector<2x8x16xf32>
    %63 = arith.mulf %61, %62 : vector<2x8x16xf32>
    %64 = arith.addf %57, %63 : vector<2x8x16xf32>
    %65 = vector.extract_strided_slice %5 {offsets = [0, 0, 2], sizes = [2, 4, 16], strides = [1, 1, 1]} : vector<2x4x18xf32> to vector<2x4x16xf32>
    %66 = vector.extract_strided_slice %65 {offsets = [0, 0, 0], sizes = [2, 1, 16], strides = [1, 1, 1]} : vector<2x4x16xf32> to vector<2x1x16xf32>
    %67 = vector.extract_strided_slice %2 {offsets = [0, 2], sizes = [8, 1], strides = [1, 1]} : vector<8x12xf32> to vector<8x1xf32>
    %68 = vector.shape_cast %67 : vector<8x1xf32> to vector<1x8x1xf32>
    %69 = vector.broadcast %66 : vector<2x1x16xf32> to vector<2x8x16xf32>
    %70 = vector.broadcast %68 : vector<1x8x1xf32> to vector<2x8x16xf32>
    %71 = arith.mulf %69, %70 : vector<2x8x16xf32>
    %72 = arith.addf %64, %71 : vector<2x8x16xf32>
    %73 = vector.extract_strided_slice %65 {offsets = [0, 1, 0], sizes = [2, 1, 16], strides = [1, 1, 1]} : vector<2x4x16xf32> to vector<2x1x16xf32>
    %74 = vector.extract_strided_slice %2 {offsets = [0, 5], sizes = [8, 1], strides = [1, 1]} : vector<8x12xf32> to vector<8x1xf32>
    %75 = vector.shape_cast %74 : vector<8x1xf32> to vector<1x8x1xf32>
    %76 = vector.broadcast %73 : vector<2x1x16xf32> to vector<2x8x16xf32>
    %77 = vector.broadcast %75 : vector<1x8x1xf32> to vector<2x8x16xf32>
    %78 = arith.mulf %76, %77 : vector<2x8x16xf32>
    %79 = arith.addf %72, %78 : vector<2x8x16xf32>
    %80 = vector.extract_strided_slice %65 {offsets = [0, 2, 0], sizes = [2, 1, 16], strides = [1, 1, 1]} : vector<2x4x16xf32> to vector<2x1x16xf32>
    %81 = vector.extract_strided_slice %2 {offsets = [0, 8], sizes = [8, 1], strides = [1, 1]} : vector<8x12xf32> to vector<8x1xf32>
    %82 = vector.shape_cast %81 : vector<8x1xf32> to vector<1x8x1xf32>
    %83 = vector.broadcast %80 : vector<2x1x16xf32> to vector<2x8x16xf32>
    %84 = vector.broadcast %82 : vector<1x8x1xf32> to vector<2x8x16xf32>
    %85 = arith.mulf %83, %84 : vector<2x8x16xf32>
    %86 = arith.addf %79, %85 : vector<2x8x16xf32>
    %87 = vector.extract_strided_slice %65 {offsets = [0, 3, 0], sizes = [2, 1, 16], strides = [1, 1, 1]} : vector<2x4x16xf32> to vector<2x1x16xf32>
    %88 = vector.extract_strided_slice %2 {offsets = [0, 11], sizes = [8, 1], strides = [1, 1]} : vector<8x12xf32> to vector<8x1xf32>
    %89 = vector.shape_cast %88 : vector<8x1xf32> to vector<1x8x1xf32>
    %90 = vector.broadcast %87 : vector<2x1x16xf32> to vector<2x8x16xf32>
    %91 = vector.broadcast %89 : vector<1x8x1xf32> to vector<2x8x16xf32>
    %92 = arith.mulf %90, %91 : vector<2x8x16xf32>
    %93 = arith.addf %86, %92 : vector<2x8x16xf32>
    %94 = vector.extract_strided_slice %93 {offsets = [0, 0, 0], sizes = [2, 8, 15], strides = [1, 1, 1]} : vector<2x8x16xf32> to vector<2x8x15xf32>
    %95 = vector.extract_strided_slice %93 {offsets = [0, 0, 1], sizes = [2, 8, 15], strides = [1, 1, 1]} : vector<2x8x16xf32> to vector<2x8x15xf32>
    %96 = arith.maximumf %94, %95 : vector<2x8x15xf32>
    %97 = vector.extract_strided_slice %96 {offsets = [0, 0, 0], sizes = [2, 8, 1], strides = [1, 1, 1]} : vector<2x8x15xf32> to vector<2x8x1xf32>
    %98 = vector.extract_strided_slice %96 {offsets = [0, 0, 2], sizes = [2, 8, 1], strides = [1, 1, 1]} : vector<2x8x15xf32> to vector<2x8x1xf32>
    %99 = vector.extract_strided_slice %96 {offsets = [0, 0, 4], sizes = [2, 8, 1], strides = [1, 1, 1]} : vector<2x8x15xf32> to vector<2x8x1xf32>
    %100 = vector.extract_strided_slice %96 {offsets = [0, 0, 6], sizes = [2, 8, 1], strides = [1, 1, 1]} : vector<2x8x15xf32> to vector<2x8x1xf32>
    %101 = vector.extract_strided_slice %96 {offsets = [0, 0, 8], sizes = [2, 8, 1], strides = [1, 1, 1]} : vector<2x8x15xf32> to vector<2x8x1xf32>
    %102 = vector.extract_strided_slice %96 {offsets = [0, 0, 10], sizes = [2, 8, 1], strides = [1, 1, 1]} : vector<2x8x15xf32> to vector<2x8x1xf32>
    %103 = vector.extract_strided_slice %96 {offsets = [0, 0, 12], sizes = [2, 8, 1], strides = [1, 1, 1]} : vector<2x8x15xf32> to vector<2x8x1xf32>
    %104 = vector.extract_strided_slice %96 {offsets = [0, 0, 14], sizes = [2, 8, 1], strides = [1, 1, 1]} : vector<2x8x15xf32> to vector<2x8x1xf32>
    %105 = tpu.concatenate %97, %98, %99, %100, %101, %102, %103, %104 in 2 : vector<2x8x1xf32>, vector<2x8x1xf32>, vector<2x8x1xf32>, vector<2x8x1xf32>, vector<2x8x1xf32>, vector<2x8x1xf32>, vector<2x8x1xf32>, vector<2x8x1xf32> -> vector<2x8x8xf32>
    %106 = vector.shape_cast %3 : vector<8x1xf32> to vector<1x8x1xf32>
    %107 = vector.broadcast %106 : vector<1x8x1xf32> to vector<2x8x8xf32>
    %108 = arith.addf %105, %107 : vector<2x8x8xf32>
    %cst_5 = arith.constant 0.000000e+00 : f32
    %109 = vector.broadcast %cst_5 : f32 to vector<2x8x8xf32>
    %110 = arith.maximumf %108, %109 : vector<2x8x8xf32>
    %c0_6 = arith.constant 0 : index
    %c0_7 = arith.constant 0 : index
    %c0_8 = arith.constant 0 : index
    %111 = vector.load %arg3[%c0_6, %c0_7, %c0_8] : memref<2x8x8xf32, #tpu.memory_space<vmem>>, vector<2x8x8xf32>
    tpu.vector_store %arg3[%c0_6, %c0_7, %c0_8], %110 {strides = array<i32>} : memref<2x8x8xf32, #tpu.memory_space<vmem>>, vector<2x8x8xf32>,
    return
  }
  func.func @transform_0(%arg0: i32) -> (i32, i32, i32) {
    %c0_i32 = arith.constant 0 : i32
    %c0_i32_0 = arith.constant 0 : i32
    %c0_i32_1 = arith.constant 0 : i32
    %c0_i32_2 = arith.constant 0 : i32
    return %c0_i32, %c0_i32_0, %c0_i32_1 : i32, i32, i32
  }
  func.func @transform_1(%arg0: i32) -> (i32, i32) {
    %c0_i32 = arith.constant 0 : i32
    %c0_i32_0 = arith.constant 0 : i32
    %c0_i32_1 = arith.constant 0 : i32
    return %c0_i32, %c0_i32_0 : i32, i32
  }
  func.func @transform_2(%arg0: i32) -> (i32, i32, i32) {
    %c0_i32 = arith.constant 0 : i32
    %c0_i32_0 = arith.constant 0 : i32
    %c0_i32_1 = arith.constant 0 : i32
    %c0_i32_2 = arith.constant 0 : i32
    return %c0_i32, %c0_i32_0, %c0_i32_1 : i32, i32, i32
  }
}

</mosaic_0001>

<bundles_post_ra>
// kernel: tpu_custom_call.1
= control target key start
LH: loop header
LB: loop body
LE: loop exit
PB: predicated region body
PF: predicated region fallthrough
CT: control target
= control target key end

     0   :  { %7 = vsyncpa [#allocation3], 0  ;;  %s598_s0 = inlined_call_operand.hbm [shape: f32[2,4,16], index: 0, kind: input, shape index: {}]   ;;  %s599_s1 = inlined_call_operand.hbm [shape: f32[8,13], index: 1, kind: input, shape index: {}]   ;;  %s600_s2 = inlined_call_operand.hbm [shape: f32[2,8,8], index: 2, kind: output, shape index: {}]  }
   0x1   :  { %8 = vsyncpa [#allocation6], 0 }
   0x2   :  { %9 = vsyncpa [#allocation4], 0  ;;  %s464_s9 = smov [#allocation2]   ;;  %s392_s13 = scalar_lea.hbm %s598_s0, 128 }
   0x3   :  { %s15_s10 = sshll.u32 %s464_s9, 4  ;;  %p393_p0 = scmp.ne.s32.totalorder %s598_s0, %s392_s13  ;;  %s16_s10 = int_to_ptr.vmem [resolvable:$true] %s15_s10 }
   0x4   :  { %p396_p1 = scmp.lt.u32.totalorder %s392_s13, %s598_s0 }
   0x6   :  { %p398_p2 = pnand %p396_p1, %p393_p0 }
   0x8   :  { %401 = shalt.err (!%p398_p2)
}
   0x9   :  { %s402_s18 = scalar_lea.vmem %s16_s10, 128  ;;  %p407_p4 = scmp.lt.s32.totalorder %s16_s10, %s16_s10 }
   0xa   :  { %p403_p3 = scmp.ne.s32.totalorder %s16_s10, %s402_s18  ;;  %p408_p5 = scmp.lt.s32.totalorder %s402_s18, %s402_s18 }
   0xc   :  { %p409_p6 = por %p408_p5, %p407_p4 }
   0xe   :  { %p410_p7 = pnand %p409_p6, %p403_p3 }
  0x10   :  { %413 = shalt.err (!%p410_p7)
}
  0x11   :  { %s465_s19 = smov 64   ;;  %s466_s20 = smov 4  }
  0x12   :  { %21 = dma.hbm_to_vmem [thread:$0]  %s598_s0, 128, %s16_s10, [#allocation3], %s465_s19, %s465_s19, %s466_s20  }
  0x13   :  { %s467_s23 = smov [#allocation5]   ;;  %s414_s27 = scalar_lea.hbm %s599_s1, 128 }
  0x14   :  { %s28_s24 = sshll.u32 %s467_s23, 4  ;;  %p415_p8 = scmp.ne.s32.totalorder %s599_s1, %s414_s27  ;;  %s29_s24 = int_to_ptr.vmem [resolvable:$true] %s28_s24 }
  0x15   :  { %p418_p9 = scmp.lt.u32.totalorder %s414_s27, %s599_s1 }
  0x17   :  { %p420_p10 = pnand %p418_p9, %p415_p8 }
  0x19   :  { %423 = shalt.err (!%p420_p10)
}
  0x1a   :  { %s424_s4 = scalar_lea.vmem %s29_s24, 128  ;;  %p429_p12 = scmp.lt.s32.totalorder %s29_s24, %s29_s24 }
  0x1b   :  { %p425_p11 = scmp.ne.s32.totalorder %s29_s24, %s424_s4  ;;  %p430_p13 = scmp.lt.s32.totalorder %s424_s4, %s424_s4 }
  0x1d   :  { %p431_p0 = por %p430_p13, %p429_p12 }
  0x1f   :  { %p432_p1 = pnand %p431_p0, %p425_p11 }
  0x21   :  { %435 = shalt.err (!%p432_p1)
}
  0x22   :  { %31 = dma.hbm_to_vmem [thread:$0]  %s599_s1, 128, %s29_s24, [#allocation6]  }
  0x23   :  { %458 = dma.done.wait [#allocation3], 128  }
  0x24   :  { %459 = vsyncadd [#allocation3], 4294967168 }
  0x25   :  { %460 = dma.done.wait [#allocation6], 128  }
  0x26   :  { %461 = vsyncadd [#allocation6], 4294967168  ;;  %v468_v0 = vmov 1   ;;  %v469_v1 = vmov 7   ;;  %v531_v2 = vld [vmem:[#allocation5] sm:$0xff]  ;;  %s470_s6 = smov 1   ;;  %v55_v15 = vlaneseq }
  0x27   :  { %379 = vset.pattern.permute.xlu0 %v468_v0  ;;  %381 = vset.pattern.permute.xlu1 %v469_v1  ;;  %v38_v3 = vld [vmem:[#allocation2] sm:$0xf]  ;;  %v39_v4 = vld [vmem:[#allocation2 + $0x4] sm:$0xf]  ;;  %v471_v5 = vmov 4   ;;  %v472_v6 = vmov 10  }
  0x28   :  { %121 = vperm.xlu0 %379, %v531_v2   ;;  %43 = vrot.lane.b32.xlu1 %v38_v3, %s470_s6  ;;  %v473_v7 = vmov 2   ;;  %v474_v8 = vmov 8   ;;  %v475_v9 = vmov 5   ;;  %v476_v10 = vmov 3   ;;  %s481_s1 = smov 127   ;;  %s482_s7 = smov 126  }
  0x29   :  { %v477_v11 = vmov 11   ;;  %v478_v12 = vmov 0   ;;  %v479_v13 = vmov 6   ;;  %v480_v14 = vmov 9   ;;  %s484_s8 = smov 125   ;;  %s485_s9 = smov 124  }
  0x2a   :  { %vm49_vm0 = vcmask 7168   ;;  %v56_v17 = vshrl.u32 %v55_v15, 7  ;;  %vm52_vm1 = vcmask 138240   ;;  %v483_v54 = vmov 12   ;;  %s486_s10 = smov 123   ;;  %s487_s11 = smov 122  }
  0x2b   :  { %s488_s12 = smov 121   ;;  %vm304_vm2 = vcmask 15360   ;;  %vm307_vm3 = vcmask 23552   ;;  %vm310_vm4 = vcmask 31744   ;;  %vm313_vm5 = vcmask 39936   ;;  %s489_s13 = smov [#allocation7]  }
  0x2c   :  { %380 = vset.pattern.permute.xlu0 %v471_v5  ;;  %45 = vrot.lane.b32.xlu1 %v39_v4, %s470_s6  ;;  %v57_v21 = vsub.s32 0, %v56_v17  ;;  %v74_v26 = vsub.s32 1, %v56_v17  ;;  %v90_v30 = vsub.s32 2, %v56_v17  ;;  %v106_v38 = vsub.s32 3, %v56_v17  ;;  %s338_s14 = sshll.u32 %s489_s13, 4  ;;  %s339_s14 = int_to_ptr.vmem [resolvable:$true] %s338_s14 }
  0x2d   :  { %137 = vperm.xlu0 %380, %v531_v2   ;;  %vm316_vm6 = vcmask 48128   ;;  %vm319_vm7 = vcmask 56320   ;;  %vm330_vm8 = vcmask 64512   ;;  %s436_s15 = scalar_lea.vmem %s339_s14, 256  ;;  %p441_p3 = scmp.lt.s32.totalorder %s339_s14, %s339_s14 }
  0x2e   :  { %p437_p2 = scmp.ne.s32.totalorder %s339_s14, %s436_s15  ;;  %p442_p4 = scmp.lt.s32.totalorder %s436_s15, %s436_s15 }
  0x30   :  { %153 = vperm.xlu1 %381, %v531_v2   ;;  %p443_p5 = por %p442_p4, %p441_p3 }
  0x31   :  { %382 = vset.pattern.permute.xlu0 %v472_v6 }
  0x32   :  { %169 = vperm.xlu0 %382, %v531_v2   ;;  %p444_p6 = pnand %p443_p5, %p437_p2 }
  0x34   :  { %383 = vset.pattern.permute.xlu1 %v473_v7 }
  0x35   :  { %185 = vperm.xlu1 %383, %v531_v2  }
  0x36   :  { %385 = vset.pattern.permute.xlu0 %v474_v8 }
  0x37   :  { %217 = vperm.xlu0 %385, %v531_v2  }
  0x39   :  { %384 = vset.pattern.permute.xlu1 %v475_v9 }
  0x3a   :  { %201 = vperm.xlu1 %384, %v531_v2  }
  0x3b   :  { %388 = vset.pattern.permute.xlu0 %v476_v10 }
  0x3c   :  { %81 = vperm.xlu0 %388, %v531_v2  }
  0x3e   :  { %386 = vset.pattern.permute.xlu1 %v477_v11 }
  0x3f   :  { %233 = vperm.xlu1 %386, %v531_v2  }
  0x40   :  { %391 = vset.pattern.permute.xlu0 %v483_v54 }
  0x43   :  { %387 = vset.pattern.permute.xlu1 %v478_v12 }
  0x44   :  { %65 = vperm.xlu1 %387, %v531_v2  }
  0x48   :  { %389 = vset.pattern.permute.xlu1 %v479_v13 }
  0x49   :  { %97 = vperm.xlu1 %389, %v531_v2  }
  0x4d   :  { %390 = vset.pattern.permute.xlu1 %v480_v14 }
  0x4e   :  { %113 = vperm.xlu1 %390, %v531_v2  }
  0x9a   :  { %v44_v16 = vpop.permute.xlu1 %43 }
  0x9b   :  { %v50_v19 = vsel %vm49_vm0, 0.0, %v44_v16 }
  0x9c   :  { %v53_v22 = vsel %vm52_vm1, %v50_v19, 0.0 }
  0x9d   :  { %v58_v24 = vrot.slane %v53_v22, %v57_v21  ;;  %v75_v31 = vrot.slane %v53_v22, %v74_v26  ;;  %v91_v36 = vrot.slane %v53_v22, %v90_v30  ;;  %v107_v43 = vrot.slane %v53_v22, %v106_v38 }
  0x9e   :  { %v46_v18 = vpop.permute.xlu1 %45 }
  0x9f   :  { %v51_v20 = vsel %vm49_vm0, 0.0, %v46_v18 }
  0xa0   :  { %v54_v23 = vsel %vm52_vm1, %v51_v20, 0.0 }
  0xa1   :  { %v62_v25 = vrot.slane %v54_v23, %v57_v21  ;;  %v79_v32 = vrot.slane %v54_v23, %v74_v26  ;;  %v95_v37 = vrot.slane %v54_v23, %v90_v30  ;;  %v111_v44 = vrot.slane %v54_v23, %v106_v38 }
  0xa7   :  { %v122_v27 = vpop.permute.xlu0 %121 }
  0xa8   :  { %v124_v28 = vmul.f32 %v122_v27, %v58_v24  ;;  %v125_v29 = vmul.f32 %v122_v27, %v62_v25 }
  0xaa   :  { %128 = vrot.lane.b32.xlu0 %v124_v28, %s481_s1  ;;  %130 = vrot.lane.b32.xlu1 %v125_v29, %s481_s1 }
  0xac   :  { %v138_v33 = vpop.permute.xlu0 %137 }
  0xad   :  { %v140_v34 = vmul.f32 %v138_v33, %v75_v31  ;;  %v141_v35 = vmul.f32 %v138_v33, %v79_v32 }
  0xaf   :  { %144 = vrot.lane.b32.xlu0 %v140_v34, %s481_s1  ;;  %146 = vrot.lane.b32.xlu1 %v141_v35, %s481_s1  ;;  %v154_v39 = vpop.permute.xlu1 %153 }
  0xb0   :  { %v156_v40 = vmul.f32 %v154_v39, %v91_v36  ;;  %v157_v41 = vmul.f32 %v154_v39, %v95_v37 }
  0xb1   :  { %v170_v42 = vpop.permute.xlu0 %169 }
  0xb2   :  { %v172_v46 = vmul.f32 %v170_v42, %v107_v43  ;;  %v173_v47 = vmul.f32 %v170_v42, %v111_v44 }
  0xb3   :  { %162 = vrot.lane.b32.xlu1 %v157_v41, %s481_s1  ;;  %160 = vrot.lane.b32.xlu0 %v156_v40, %s481_s1 }
  0xb4   :  { %v186_v45 = vpop.permute.xlu1 %185 }
  0xb5   :  { %v188_v48 = vmul.f32 %v186_v45, %v58_v24  ;;  %v189_v49 = vmul.f32 %v186_v45, %v62_v25 }
  0xb6   :  { %v218_v51 = vpop.permute.xlu0 %217 }
  0xb7   :  { %178 = vrot.lane.b32.xlu1 %v173_v47, %s481_s1  ;;  %176 = vrot.lane.b32.xlu0 %v172_v46, %s481_s1  ;;  %v220_v56 = vmul.f32 %v218_v51, %v91_v36  ;;  %v221_v57 = vmul.f32 %v218_v51, %v95_v37 }
  0xb9   :  { %v202_v50 = vpop.permute.xlu1 %201 }
  0xba   :  { %v204_v52 = vmul.f32 %v202_v50, %v75_v31  ;;  %v205_v53 = vmul.f32 %v202_v50, %v79_v32 }
  0xbb   :  { %194 = vrot.lane.b32.xlu1 %v189_v49, %s482_s7  ;;  %192 = vrot.lane.b32.xlu0 %v188_v48, %s482_s7  ;;  %v82_v58 = vpop.permute.xlu0 %81 }
  0xbc   :  { %v84_v60 = vmul.f32 %v82_v58, %v75_v31  ;;  %v85_v61 = vmul.f32 %v82_v58, %v79_v32 }
  0xbe   :  { %v234_v55 = vpop.permute.xlu1 %233 }
  0xbf   :  { %210 = vrot.lane.b32.xlu1 %v205_v53, %s482_s7  ;;  %208 = vrot.lane.b32.xlu0 %v204_v52, %s482_s7  ;;  %v236_v0 = vmul.f32 %v234_v55, %v107_v43  ;;  %v237_v1 = vmul.f32 %v234_v55, %v111_v44 }
  0xc3   :  { %226 = vrot.lane.b32.xlu1 %v221_v57, %s482_s7  ;;  %224 = vrot.lane.b32.xlu0 %v220_v56, %s482_s7  ;;  %v66_v59 = vpop.permute.xlu1 %65 }
  0xc4   :  { %v68_v62 = vmul.f32 %v66_v59, %v58_v24  ;;  %v69_v63 = vmul.f32 %v66_v59, %v62_v25 }
  0xc6   :  { %v86_v3 = vadd.f32 %v84_v60, %v68_v62  ;;  %v87_v4 = vadd.f32 %v85_v61, %v69_v63 }
  0xc7   :  { %242 = vrot.lane.b32.xlu1 %v237_v1, %s482_s7  ;;  %240 = vrot.lane.b32.xlu0 %v236_v0, %s482_s7 }
  0xc8   :  { %v98_v5 = vpop.permute.xlu1 %97 }
  0xc9   :  { %v100_v6 = vmul.f32 %v98_v5, %v91_v36  ;;  %v101_v7 = vmul.f32 %v98_v5, %v95_v37 }
  0xcb   :  { %v102_v8 = vadd.f32 %v100_v6, %v86_v3  ;;  %v103_v9 = vadd.f32 %v101_v7, %v87_v4 }
  0xcd   :  { %v114_v10 = vpop.permute.xlu1 %113 }
  0xce   :  { %v116_v11 = vmul.f32 %v114_v10, %v107_v43  ;;  %v117_v12 = vmul.f32 %v114_v10, %v111_v44 }
  0xd0   :  { %v118_v13 = vadd.f32 %v116_v11, %v102_v8  ;;  %v119_v14 = vadd.f32 %v117_v12, %v103_v9 }
 0x11c   :  { %v129_v15 = vpop.permute.xlu0 %128  ;;  %v131_v16 = vpop.permute.xlu1 %130 }
 0x11d   :  { %v134_v23 = vadd.f32 %v129_v15, %v118_v13  ;;  %v135_v24 = vadd.f32 %v131_v16, %v119_v14 }
 0x121   :  { %v145_v17 = vpop.permute.xlu0 %144  ;;  %v147_v18 = vpop.permute.xlu1 %146 }
 0x122   :  { %v150_v27 = vadd.f32 %v145_v17, %v134_v23  ;;  %v151_v28 = vadd.f32 %v147_v18, %v135_v24 }
 0x125   :  { %v161_v19 = vpop.permute.xlu0 %160  ;;  %v163_v20 = vpop.permute.xlu1 %162 }
 0x126   :  { %v166_v29 = vadd.f32 %v161_v19, %v150_v27  ;;  %v167_v30 = vadd.f32 %v163_v20, %v151_v28 }
 0x129   :  { %v177_v21 = vpop.permute.xlu0 %176  ;;  %v179_v22 = vpop.permute.xlu1 %178 }
 0x12a   :  { %v182_v33 = vadd.f32 %v177_v21, %v166_v29  ;;  %v183_v34 = vadd.f32 %v179_v22, %v167_v30 }
 0x12d   :  { %v193_v25 = vpop.permute.xlu0 %192  ;;  %v195_v26 = vpop.permute.xlu1 %194 }
 0x12e   :  { %v198_v35 = vadd.f32 %v193_v25, %v182_v33  ;;  %v199_v36 = vadd.f32 %v195_v26, %v183_v34 }
 0x131   :  { %v209_v31 = vpop.permute.xlu0 %208  ;;  %v211_v32 = vpop.permute.xlu1 %210 }
 0x132   :  { %v214_v39 = vadd.f32 %v209_v31, %v198_v35  ;;  %v215_v40 = vadd.f32 %v211_v32, %v199_v36 }
 0x135   :  { %v225_v37 = vpop.permute.xlu0 %224  ;;  %v227_v38 = vpop.permute.xlu1 %226 }
 0x136   :  { %v230_v41 = vadd.f32 %v225_v37, %v214_v39  ;;  %v231_v42 = vadd.f32 %v227_v38, %v215_v40 }
 0x139   :  { %v241_v43 = vpop.permute.xlu0 %240  ;;  %v243_v44 = vpop.permute.xlu1 %242 }
 0x13a   :  { %v246_v45 = vadd.f32 %v241_v43, %v230_v41  ;;  %v247_v46 = vadd.f32 %v243_v44, %v231_v42 }
 0x13c   :  { %250 = vrot.lane.b32.xlu0 %v246_v45, %s481_s1  ;;  %252 = vrot.lane.b32.xlu1 %v247_v46, %s481_s1 }
 0x140   :  { %323 = vperm.xlu0 %391, %v531_v2  }
 0x1ae   :  { %v251_v47 = vpop.permute.xlu0 %250  ;;  %v253_v48 = vpop.permute.xlu1 %252 }
 0x1af   :  { %v256_v49 = vmax.f32 %v246_v45, %v251_v47  ;;  %v257_v50 = vmax.f32 %v247_v46, %v253_v48 }
 0x1b1   :  { %260 = vrot.lane.b32.xlu0 %v256_v49, %s481_s1  ;;  %262 = vrot.lane.b32.xlu1 %v257_v50, %s481_s1 }
 0x1b5   :  { %272 = vrot.lane.b32.xlu0 %v256_v49, %s484_s8  ;;  %266 = vrot.lane.b32.xlu1 %v256_v49, %s482_s7 }
 0x1b9   :  { %278 = vrot.lane.b32.xlu0 %v256_v49, %s485_s9  ;;  %268 = vrot.lane.b32.xlu1 %v257_v50, %s482_s7 }
 0x1bd   :  { %284 = vrot.lane.b32.xlu0 %v256_v49, %s486_s10  ;;  %274 = vrot.lane.b32.xlu1 %v257_v50, %s484_s8 }
 0x1bf   :  { %v324_v2 = vpop.permute.xlu0 %323 }
 0x1c1   :  { %290 = vrot.lane.b32.xlu0 %v256_v49, %s487_s11  ;;  %280 = vrot.lane.b32.xlu1 %v257_v50, %s485_s9 }
 0x1c5   :  { %296 = vrot.lane.b32.xlu0 %v256_v49, %s488_s12  ;;  %286 = vrot.lane.b32.xlu1 %v257_v50, %s486_s10 }
 0x1c9   :  { %292 = vrot.lane.b32.xlu1 %v257_v50, %s487_s11 }
 0x1cd   :  { %298 = vrot.lane.b32.xlu1 %v257_v50, %s488_s12 }
 0x223   :  { %v261_v51 = vpop.permute.xlu0 %260  ;;  %v263_v52 = vpop.permute.xlu1 %262 }
 0x224   :  { %v302_v59 = vsel %vm49_vm0, %v256_v49, %v261_v51  ;;  %v303_v8 = vsel %vm49_vm0, %v257_v50, %v263_v52 }
 0x227   :  { %v273_v53 = vpop.permute.xlu0 %272  ;;  %v267_v54 = vpop.permute.xlu1 %266 }
 0x228   :  { %v305_v60 = vsel %vm304_vm2, %v302_v59, %v267_v54 }
 0x229   :  { %v308_v63 = vsel %vm307_vm3, %v305_v60, %v273_v53 }
 0x22b   :  { %v279_v55 = vpop.permute.xlu0 %278  ;;  %v269_v56 = vpop.permute.xlu1 %268 }
 0x22c   :  { %v311_v0 = vsel %vm310_vm4, %v308_v63, %v279_v55  ;;  %v306_v9 = vsel %vm304_vm2, %v303_v8, %v269_v56 }
 0x22f   :  { %v285_v57 = vpop.permute.xlu0 %284  ;;  %v275_v58 = vpop.permute.xlu1 %274 }
 0x230   :  { %v314_v1 = vsel %vm313_vm5, %v311_v0, %v285_v57  ;;  %v309_v12 = vsel %vm307_vm3, %v306_v9, %v275_v58 }
 0x233   :  { %v291_v61 = vpop.permute.xlu0 %290  ;;  %v281_v62 = vpop.permute.xlu1 %280 }
 0x234   :  { %v317_v3 = vsel %vm316_vm6, %v314_v1, %v291_v61  ;;  %v312_v13 = vsel %vm310_vm4, %v309_v12, %v281_v62 }
 0x237   :  { %v297_v4 = vpop.permute.xlu0 %296  ;;  %v287_v5 = vpop.permute.xlu1 %286 }
 0x238   :  { %v320_v6 = vsel %vm319_vm7, %v317_v3, %v297_v4  ;;  %v315_v14 = vsel %vm313_vm5, %v312_v13, %v287_v5 }
 0x239   :  { %v326_v7 = vadd.f32 %v324_v2, %v320_v6 }
 0x23b   :  { %v328_v10 = vmax.f32 %v326_v7, 0.0  ;;  %v293_v11 = vpop.permute.xlu1 %292 }
 0x23c   :  { %v318_v15 = vsel %vm316_vm6, %v315_v14, %v293_v11 }
 0x23d   :  { %331 = vst.msk [vmem:[#allocation7] sm:$0xff] %vm330_vm8, %v328_v10 }
 0x23f   :  { %v299_v16 = vpop.permute.xlu1 %298 }
 0x240   :  { %v321_v17 = vsel %vm319_vm7, %v318_v15, %v299_v16 }
 0x241   :  { %v327_v18 = vadd.f32 %v324_v2, %v321_v17 }
 0x243   :  { %v329_v19 = vmax.f32 %v327_v18, 0.0 }
 0x245   :  { %332 = vst.msk [vmem:[#allocation7 + $0x8] sm:$0xff] %vm330_vm8, %v329_v19 }
 0x246   :  { %447 = shalt.err (!%p444_p6)
}
 0x247   :  { %s448_s18 = scalar_lea.hbm %s600_s2, 256 }
 0x248   :  { %p449_p7 = scmp.ne.s32.totalorder %s600_s2, %s448_s18  ;;  %p452_p8 = scmp.lt.u32.totalorder %s448_s18, %s600_s2 }
 0x24a   :  { %p454_p9 = pnand %p452_p8, %p449_p7 }
 0x24c   :  { %457 = shalt.err (!%p454_p9)
}
 0x24d   :  { %s490_s23 = smov 128   ;;  %s491_s24 = smov 8  }
 0x24e   :  { %344 = dma.vmem_to_hbm [thread:$0]  %s339_s14, 256, %s600_s2, [#allocation4], %s490_s23, %s490_s23, %s491_s24  }
 0x24f   :  { %462 = dma.done.wait [#allocation4], 256  }
 0x250   :  { %463 = vsyncadd [#allocation4], 4294967040 }
 0x251   :  { %348 = vsyncpa [#allocation3], 1 }
 0x252   :  { %349 = vsyncpa [#allocation6], 1 }
 0x253   :  { %350 = vsyncpa [#allocation4], 1 }

</bundles_post_ra>
